<compile_context>
chip_gen: v7x
topology: tpu7x:2x2x1
jax: 0.10.0
libtpu: 0.0.40
codegen_flags: <defaults>
</compile_context>

<pallas_src>
import math
import numpy as np
import jax
import jax.numpy as jnp
from jax import lax
from jax.experimental import pallas as pl
from jax.experimental.pallas import tpu as pltpu

# ---- model hyper-parameters (small, consistent with the module) ----
B = 2          # batch
S = 8          # sequence length
DIM = 32       # embed dim
HEADS = 4      # num heads
HEAD_DIM = DIM // HEADS
NTOK = B * S   # tokens with batch folded into the M dimension
LN_EPS = 1e-5

# ---- packed parameter-slab layout (single (SLAB_ROWS, 128) f32 operand) ----
SLAB_LANES = 4 * DIM            # 128 lanes
W_ROWS = DIM                    # rows 0:32  -> weight block (32, 128)
VEC_ROW = DIM                   # rows 32:40 -> packed vectors (8, 128)
MASK_ROW = DIM + 8              # rows 40:56 -> additive block-diag mask (lanes 0:16)
SLAB_ROWS = MASK_ROW + NTOK     # 56


def transformer_kernel(x_ref, slab_ref, out_ref):
    xf = x_ref[...]                                            # (16, 32)

    w = slab_ref[0:W_ROWS, :]                                  # (32, 128)
    vecs = slab_ref[VEC_ROW:VEC_ROW + 8, :]                    # (8, 128)
    mask_bias = slab_ref[MASK_ROW:MASK_ROW + NTOK, 0:NTOK]     # (16, 16)

    # ---- fused QKV projection: single full-width MXU push --------------------
    # lanes 0:96 of the result hold [q|k|v]; lanes 96:128 (x @ Wo^T) are unused.
    qkv = jnp.dot(xf, w, preferred_element_type=jnp.float32) + vecs[0:1, :]

    # ---- per-head attention; batches kept separate via block-diagonal mask ---
    dn = (((1,), (1,)), ((), ()))          # contract last dims (no explicit k^T)
    heads_out = []
    for h in range(HEADS):
        lo = h * HEAD_DIM
        qh = qkv[:, lo:lo + HEAD_DIM]                          # (16, 8)
        kh = qkv[:, DIM + lo:DIM + lo + HEAD_DIM]              # (16, 8)
        vh = qkv[:, 2 * DIM + lo:2 * DIM + lo + HEAD_DIM]      # (16, 8)

        s = lax.dot_general(qh, kh, dn, preferred_element_type=jnp.float32)
        s = s + mask_bias                                      # (16, 16)
        s_max = jnp.max(s, axis=-1, keepdims=True)
        p = jnp.exp(s - s_max)
        p = p / jnp.sum(p, axis=-1, keepdims=True)
        heads_out.append(jnp.dot(p, vh, preferred_element_type=jnp.float32))

    # ---- single full-depth output projection (one MXU push, K=32) ------------
    o_all = jnp.concatenate(heads_out, axis=-1)                # (16, 32)
    wo_t = w[:, 3 * DIM:4 * DIM]                               # (32, 32) = Wo^T
    attn = jnp.dot(o_all, wo_t, preferred_element_type=jnp.float32) \
        + vecs[1:2, 0:DIM]                                     # + bo

    # ---- LayerNorm over last dim + residual ----------------------------------
    gamma = vecs[2:3, 0:DIM]
    beta = vecs[3:4, 0:DIM]
    mu = jnp.mean(attn, axis=-1, keepdims=True)
    xc = attn - mu
    var = jnp.mean(xc * xc, axis=-1, keepdims=True)
    ln = xc * lax.rsqrt(var + LN_EPS) * gamma + beta

    out_ref[...] = ln + xf


def pack_params(in_proj_w, in_proj_b, out_proj_w, out_proj_b, ln_gamma, ln_beta):
    """One-time, parameter-load-time packing of all weights/vectors/mask into a
    single lane-dense (56, 128) slab.  PyTorch MultiheadAttention layout:
    in_proj_w (3D, D), in_proj_b (3D,), out_proj_w (D, D), out_proj_b (D,)."""
    scale = 1.0 / math.sqrt(HEAD_DIM)
    in_proj_w = np.asarray(in_proj_w, np.float32)
    in_proj_b = np.asarray(in_proj_b, np.float32)
    out_proj_w = np.asarray(out_proj_w, np.float32)
    out_proj_b = np.asarray(out_proj_b, np.float32)
    ln_gamma = np.asarray(ln_gamma, np.float32)
    ln_beta = np.asarray(ln_beta, np.float32)

    wq, wk, wv = in_proj_w[:DIM], in_proj_w[DIM:2 * DIM], in_proj_w[2 * DIM:]
    bq, bk, bv = in_proj_b[:DIM], in_proj_b[DIM:2 * DIM], in_proj_b[2 * DIM:]

    slab = np.zeros((SLAB_ROWS, SLAB_LANES), np.float32)
    # weight block: [Wq^T*scale | Wk^T | Wv^T | Wo^T]  (attention scale folded)
    slab[0:W_ROWS, :] = np.concatenate(
        [wq.T * scale, wk.T, wv.T, out_proj_w.T], axis=1)
    # packed vectors
    slab[VEC_ROW, 0:3 * DIM] = np.concatenate([bq * scale, bk, bv])
    slab[VEC_ROW + 1, 0:DIM] = out_proj_b
    slab[VEC_ROW + 2, 0:DIM] = ln_gamma
    slab[VEC_ROW + 3, 0:DIM] = ln_beta
    # static block-diagonal additive mask: attend only within the same batch
    row_b = np.arange(NTOK)[:, None] // S
    col_b = np.arange(NTOK)[None, :] // S
    slab[MASK_ROW:MASK_ROW + NTOK, 0:NTOK] = np.where(
        row_b == col_b, 0.0, -1e30).astype(np.float32)
    return jnp.asarray(slab)


@jax.jit
def transformer_forward(x, slab):
    """x: (B, S, D) float32; slab: packed (SLAB_ROWS, 128) parameter slab."""
    xf = x.reshape(NTOK, DIM)          # tokens, batch folded into M dim
    out = pl.pallas_call(
        transformer_kernel,
        out_shape=jax.ShapeDtypeStruct((NTOK, DIM), jnp.float32),
        grid_spec=pltpu.PrefetchScalarGridSpec(
            num_scalar_prefetch=0,
            grid=(1,),                                         # single grid step
            in_specs=[
                pl.BlockSpec((NTOK, DIM), lambda i: (0, 0)),         # x tokens
                pl.BlockSpec((SLAB_ROWS, SLAB_LANES), lambda i: (0, 0)),  # slab
            ],
            out_specs=pl.BlockSpec((NTOK, DIM), lambda i: (0, 0)),
        ),
        compiler_params=pltpu.CompilerParams(
            dimension_semantics=("arbitrary",)),
    )(xf, slab)
    return out.reshape(B, S, DIM)


def reference_forward(x, in_proj_w, in_proj_b, out_proj_w, out_proj_b,
                      ln_gamma, ln_beta):
    """Pure-JAX reference matching torch.nn.MultiheadAttention + LayerNorm."""
    qkv = jnp.einsum('bsd,ed->bse', x, in_proj_w) + in_proj_b      # (B,S,3D)
    q, k, v = jnp.split(qkv, 3, axis=-1)

    def split_heads(t):
        return t.reshape(B, S, HEADS, HEAD_DIM).transpose(0, 2, 1, 3)

    qh, kh, vh = split_heads(q), split_heads(k), split_heads(v)
    s = jnp.einsum('bhqd,bhkd->bhqk', qh, kh) / math.sqrt(HEAD_DIM)
    p = jax.nn.softmax(s, axis=-1)
    o = jnp.einsum('bhqk,bhkd->bhqd', p, vh)
    o = o.transpose(0, 2, 1, 3).reshape(B, S, DIM)
    o = jnp.einsum('bsd,ed->bse', o, out_proj_w) + out_proj_b
    mu = o.mean(-1, keepdims=True)
    var = ((o - mu) ** 2).mean(-1, keepdims=True)
    ln = (o - mu) / jnp.sqrt(var + LN_EPS) * ln_gamma + ln_beta
    return ln + x


if __name__ == "__main__":
    key = jax.random.PRNGKey(0)
    kx, k1, k2, k3, k4 = jax.random.split(key, 5)

    x = jax.random.normal(kx, (B, S, DIM), dtype=jnp.float32)

    # deterministic parameter init (xavier-ish scales; LayerNorm = identity init)
    in_proj_w = jax.random.normal(k1, (3 * DIM, DIM), dtype=jnp.float32) * (1.0 / math.sqrt(DIM))
    in_proj_b = jax.random.normal(k2, (3 * DIM,), dtype=jnp.float32) * 0.01
    out_proj_w = jax.random.normal(k3, (DIM, DIM), dtype=jnp.float32) * (1.0 / math.sqrt(DIM))
    out_proj_b = jax.random.normal(k4, (DIM,), dtype=jnp.float32) * 0.01
    ln_gamma = jnp.ones((DIM,), dtype=jnp.float32)
    ln_beta = jnp.zeros((DIM,), dtype=jnp.float32)

    # one-time parameter packing (done at load time, outside the jitted forward)
    slab = pack_params(in_proj_w, in_proj_b, out_proj_w, out_proj_b,
                       ln_gamma, ln_beta)

    out = transformer_forward(x, slab)
    out = jax.block_until_ready(out)

    ref = reference_forward(x, in_proj_w, in_proj_b, out_proj_w, out_proj_b,
                            ln_gamma, ln_beta)
    assert out.shape == (B, S, DIM)
    assert jnp.allclose(out, ref, atol=1e-4, rtol=1e-4), "mismatch vs reference"

    print("KERNEL_OK")
</pallas_src>

<mosaic_0001>
module attributes {stable_mosaic.version = 11 : i64} {
  func.func @transformer_kernel(%arg0: i32, %arg1: memref<16x32xf32, #tpu.memory_space<vmem>>, %arg2: memref<56x128xf32, #tpu.memory_space<vmem>>, %arg3: memref<16x32xf32, #tpu.memory_space<vmem>>) attributes {dimension_semantics = [#tpu.dimension_semantics<arbitrary>], iteration_bounds = array<i64: 1>, scalar_prefetch = 0 : i64, scratch_operands = 0 : i64, tpu.core_type = #tpu.core_type<tc>, window_params = [{pipeline_mode = #tpu.pipeline_mode<synchronous>, transform_indices = @transform_0, window_bounds = array<i64: 16, 32>}, {pipeline_mode = #tpu.pipeline_mode<synchronous>, transform_indices = @transform_1, window_bounds = array<i64: 56, 128>}, {pipeline_mode = #tpu.pipeline_mode<synchronous>, transform_indices = @transform_2, window_bounds = array<i64: 16, 32>}]} {
    %c0 = arith.constant 0 : index
    %c0_0 = arith.constant 0 : index
    %0 = vector.load %arg1[%c0, %c0_0] : memref<16x32xf32, #tpu.memory_space<vmem>>, vector<16x32xf32>
    %c0_1 = arith.constant 0 : index
    %c0_2 = arith.constant 0 : index
    %1 = vector.load %arg2[%c0_1, %c0_2] : memref<56x128xf32, #tpu.memory_space<vmem>>, vector<32x128xf32>
    %c32 = arith.constant 32 : index
    %c0_3 = arith.constant 0 : index
    %2 = vector.load %arg2[%c32, %c0_3] : memref<56x128xf32, #tpu.memory_space<vmem>>, vector<8x128xf32>
    %c40 = arith.constant 40 : index
    %c0_4 = arith.constant 0 : index
    %3 = vector.load %arg2[%c40, %c0_4] : memref<56x128xf32, #tpu.memory_space<vmem>>, vector<16x16xf32>
    %cst = arith.constant dense<0.000000e+00> : vector<16x128xf32>
    %4 = tpu.matmul %0, %1, %cst {dimension_numbers = #tpu.dot_dimension_numbers<[1], [0], [0], [1], [0, 0, 1, 1], [], []>} : vector<16x32xf32>, vector<32x128xf32>, vector<16x128xf32> -> vector<16x128xf32>
    %5 = vector.extract_strided_slice %2 {offsets = [0, 0], sizes = [1, 128], strides = [1, 1]} : vector<8x128xf32> to vector<1x128xf32>
    %6 = vector.broadcast %5 : vector<1x128xf32> to vector<16x128xf32>
    %7 = arith.addf %4, %6 : vector<16x128xf32>
    %8 = vector.extract_strided_slice %7 {offsets = [0, 0], sizes = [16, 8], strides = [1, 1]} : vector<16x128xf32> to vector<16x8xf32>
    %9 = vector.extract_strided_slice %7 {offsets = [0, 32], sizes = [16, 8], strides = [1, 1]} : vector<16x128xf32> to vector<16x8xf32>
    %10 = vector.extract_strided_slice %7 {offsets = [0, 64], sizes = [16, 8], strides = [1, 1]} : vector<16x128xf32> to vector<16x8xf32>
    %cst_5 = arith.constant dense<0.000000e+00> : vector<16x16xf32>
    %11 = tpu.matmul %8, %9, %cst_5 {dimension_numbers = #tpu.dot_dimension_numbers<[1], [1], [0], [0], [0, 0, 1, 0], [], []>} : vector<16x8xf32>, vector<16x8xf32>, vector<16x16xf32> -> vector<16x16xf32>
    %12 = arith.addf %11, %3 : vector<16x16xf32>
    %cst_6 = arith.constant dense<0xFF800000> : vector<16xf32>
    %13 = vector.multi_reduction <maximumf>, %12, %cst_6 [1] : vector<16x16xf32> to vector<16xf32>
    %14 = vector.shape_cast %13 : vector<16xf32> to vector<16x1xf32>
    %15 = vector.broadcast %14 : vector<16x1xf32> to vector<16x16xf32>
    %16 = arith.subf %12, %15 : vector<16x16xf32>
    %17 = math.exp %16 : vector<16x16xf32>
    %cst_7 = arith.constant dense<0.000000e+00> : vector<16xf32>
    %18 = vector.multi_reduction <add>, %17, %cst_7 [1] : vector<16x16xf32> to vector<16xf32>
    %19 = vector.shape_cast %18 : vector<16xf32> to vector<16x1xf32>
    %20 = vector.broadcast %19 : vector<16x1xf32> to vector<16x16xf32>
    %21 = arith.divf %17, %20 : vector<16x16xf32>
    %cst_8 = arith.constant dense<0.000000e+00> : vector<16x8xf32>
    %22 = tpu.matmul %21, %10, %cst_8 {dimension_numbers = #tpu.dot_dimension_numbers<[1], [0], [0], [1], [0, 0, 1, 1], [], []>} : vector<16x16xf32>, vector<16x8xf32>, vector<16x8xf32> -> vector<16x8xf32>
    %23 = vector.extract_strided_slice %7 {offsets = [0, 8], sizes = [16, 8], strides = [1, 1]} : vector<16x128xf32> to vector<16x8xf32>
    %24 = vector.extract_strided_slice %7 {offsets = [0, 40], sizes = [16, 8], strides = [1, 1]} : vector<16x128xf32> to vector<16x8xf32>
    %25 = vector.extract_strided_slice %7 {offsets = [0, 72], sizes = [16, 8], strides = [1, 1]} : vector<16x128xf32> to vector<16x8xf32>
    %cst_9 = arith.constant dense<0.000000e+00> : vector<16x16xf32>
    %26 = tpu.matmul %23, %24, %cst_9 {dimension_numbers = #tpu.dot_dimension_numbers<[1], [1], [0], [0], [0, 0, 1, 0], [], []>} : vector<16x8xf32>, vector<16x8xf32>, vector<16x16xf32> -> vector<16x16xf32>
    %27 = arith.addf %26, %3 : vector<16x16xf32>
    %cst_10 = arith.constant dense<0xFF800000> : vector<16xf32>
    %28 = vector.multi_reduction <maximumf>, %27, %cst_10 [1] : vector<16x16xf32> to vector<16xf32>
    %29 = vector.shape_cast %28 : vector<16xf32> to vector<16x1xf32>
    %30 = vector.broadcast %29 : vector<16x1xf32> to vector<16x16xf32>
    %31 = arith.subf %27, %30 : vector<16x16xf32>
    %32 = math.exp %31 : vector<16x16xf32>
    %cst_11 = arith.constant dense<0.000000e+00> : vector<16xf32>
    %33 = vector.multi_reduction <add>, %32, %cst_11 [1] : vector<16x16xf32> to vector<16xf32>
    %34 = vector.shape_cast %33 : vector<16xf32> to vector<16x1xf32>
    %35 = vector.broadcast %34 : vector<16x1xf32> to vector<16x16xf32>
    %36 = arith.divf %32, %35 : vector<16x16xf32>
    %cst_12 = arith.constant dense<0.000000e+00> : vector<16x8xf32>
    %37 = tpu.matmul %36, %25, %cst_12 {dimension_numbers = #tpu.dot_dimension_numbers<[1], [0], [0], [1], [0, 0, 1, 1], [], []>} : vector<16x16xf32>, vector<16x8xf32>, vector<16x8xf32> -> vector<16x8xf32>
    %38 = vector.extract_strided_slice %7 {offsets = [0, 16], sizes = [16, 8], strides = [1, 1]} : vector<16x128xf32> to vector<16x8xf32>
    %39 = vector.extract_strided_slice %7 {offsets = [0, 48], sizes = [16, 8], strides = [1, 1]} : vector<16x128xf32> to vector<16x8xf32>
    %40 = vector.extract_strided_slice %7 {offsets = [0, 80], sizes = [16, 8], strides = [1, 1]} : vector<16x128xf32> to vector<16x8xf32>
    %cst_13 = arith.constant dense<0.000000e+00> : vector<16x16xf32>
    %41 = tpu.matmul %38, %39, %cst_13 {dimension_numbers = #tpu.dot_dimension_numbers<[1], [1], [0], [0], [0, 0, 1, 0], [], []>} : vector<16x8xf32>, vector<16x8xf32>, vector<16x16xf32> -> vector<16x16xf32>
    %42 = arith.addf %41, %3 : vector<16x16xf32>
    %cst_14 = arith.constant dense<0xFF800000> : vector<16xf32>
    %43 = vector.multi_reduction <maximumf>, %42, %cst_14 [1] : vector<16x16xf32> to vector<16xf32>
    %44 = vector.shape_cast %43 : vector<16xf32> to vector<16x1xf32>
    %45 = vector.broadcast %44 : vector<16x1xf32> to vector<16x16xf32>
    %46 = arith.subf %42, %45 : vector<16x16xf32>
    %47 = math.exp %46 : vector<16x16xf32>
    %cst_15 = arith.constant dense<0.000000e+00> : vector<16xf32>
    %48 = vector.multi_reduction <add>, %47, %cst_15 [1] : vector<16x16xf32> to vector<16xf32>
    %49 = vector.shape_cast %48 : vector<16xf32> to vector<16x1xf32>
    %50 = vector.broadcast %49 : vector<16x1xf32> to vector<16x16xf32>
    %51 = arith.divf %47, %50 : vector<16x16xf32>
    %cst_16 = arith.constant dense<0.000000e+00> : vector<16x8xf32>
    %52 = tpu.matmul %51, %40, %cst_16 {dimension_numbers = #tpu.dot_dimension_numbers<[1], [0], [0], [1], [0, 0, 1, 1], [], []>} : vector<16x16xf32>, vector<16x8xf32>, vector<16x8xf32> -> vector<16x8xf32>
    %53 = vector.extract_strided_slice %7 {offsets = [0, 24], sizes = [16, 8], strides = [1, 1]} : vector<16x128xf32> to vector<16x8xf32>
    %54 = vector.extract_strided_slice %7 {offsets = [0, 56], sizes = [16, 8], strides = [1, 1]} : vector<16x128xf32> to vector<16x8xf32>
    %55 = vector.extract_strided_slice %7 {offsets = [0, 88], sizes = [16, 8], strides = [1, 1]} : vector<16x128xf32> to vector<16x8xf32>
    %cst_17 = arith.constant dense<0.000000e+00> : vector<16x16xf32>
    %56 = tpu.matmul %53, %54, %cst_17 {dimension_numbers = #tpu.dot_dimension_numbers<[1], [1], [0], [0], [0, 0, 1, 0], [], []>} : vector<16x8xf32>, vector<16x8xf32>, vector<16x16xf32> -> vector<16x16xf32>
    %57 = arith.addf %56, %3 : vector<16x16xf32>
    %cst_18 = arith.constant dense<0xFF800000> : vector<16xf32>
    %58 = vector.multi_reduction <maximumf>, %57, %cst_18 [1] : vector<16x16xf32> to vector<16xf32>
    %59 = vector.shape_cast %58 : vector<16xf32> to vector<16x1xf32>
    %60 = vector.broadcast %59 : vector<16x1xf32> to vector<16x16xf32>
    %61 = arith.subf %57, %60 : vector<16x16xf32>
    %62 = math.exp %61 : vector<16x16xf32>
    %cst_19 = arith.constant dense<0.000000e+00> : vector<16xf32>
    %63 = vector.multi_reduction <add>, %62, %cst_19 [1] : vector<16x16xf32> to vector<16xf32>
    %64 = vector.shape_cast %63 : vector<16xf32> to vector<16x1xf32>
    %65 = vector.broadcast %64 : vector<16x1xf32> to vector<16x16xf32>
    %66 = arith.divf %62, %65 : vector<16x16xf32>
    %cst_20 = arith.constant dense<0.000000e+00> : vector<16x8xf32>
    %67 = tpu.matmul %66, %55, %cst_20 {dimension_numbers = #tpu.dot_dimension_numbers<[1], [0], [0], [1], [0, 0, 1, 1], [], []>} : vector<16x16xf32>, vector<16x8xf32>, vector<16x8xf32> -> vector<16x8xf32>
    %68 = tpu.concatenate %22, %37, %52, %67 in 1 : vector<16x8xf32>, vector<16x8xf32>, vector<16x8xf32>, vector<16x8xf32> -> vector<16x32xf32>
    %69 = vector.extract_strided_slice %1 {offsets = [0, 96], sizes = [32, 32], strides = [1, 1]} : vector<32x128xf32> to vector<32x32xf32>
    %cst_21 = arith.constant dense<0.000000e+00> : vector<16x32xf32>
    %70 = tpu.matmul %68, %69, %cst_21 {dimension_numbers = #tpu.dot_dimension_numbers<[1], [0], [0], [1], [0, 0, 1, 1], [], []>} : vector<16x32xf32>, vector<32x32xf32>, vector<16x32xf32> -> vector<16x32xf32>
    %71 = vector.extract_strided_slice %2 {offsets = [1, 0], sizes = [1, 32], strides = [1, 1]} : vector<8x128xf32> to vector<1x32xf32>
    %72 = vector.broadcast %71 : vector<1x32xf32> to vector<16x32xf32>
    %73 = arith.addf %70, %72 : vector<16x32xf32>
    %74 = vector.extract_strided_slice %2 {offsets = [2, 0], sizes = [1, 32], strides = [1, 1]} : vector<8x128xf32> to vector<1x32xf32>
    %75 = vector.extract_strided_slice %2 {offsets = [3, 0], sizes = [1, 32], strides = [1, 1]} : vector<8x128xf32> to vector<1x32xf32>
    %cst_22 = arith.constant dense<0.000000e+00> : vector<16xf32>
    %76 = vector.multi_reduction <add>, %73, %cst_22 [1] : vector<16x32xf32> to vector<16xf32>
    %77 = vector.shape_cast %76 : vector<16xf32> to vector<16x1xf32>
    %cst_23 = arith.constant 3.200000e+01 : f32
    %78 = vector.broadcast %cst_23 : f32 to vector<16x1xf32>
    %79 = arith.divf %77, %78 : vector<16x1xf32>
    %80 = vector.broadcast %79 : vector<16x1xf32> to vector<16x32xf32>
    %81 = arith.subf %73, %80 : vector<16x32xf32>
    %82 = arith.mulf %81, %81 : vector<16x32xf32>
    %cst_24 = arith.constant dense<0.000000e+00> : vector<16xf32>
    %83 = vector.multi_reduction <add>, %82, %cst_24 [1] : vector<16x32xf32> to vector<16xf32>
    %84 = vector.shape_cast %83 : vector<16xf32> to vector<16x1xf32>
    %cst_25 = arith.constant 3.200000e+01 : f32
    %85 = vector.broadcast %cst_25 : f32 to vector<16x1xf32>
    %86 = arith.divf %84, %85 : vector<16x1xf32>
    %cst_26 = arith.constant 9.99999974E-6 : f32
    %87 = vector.broadcast %cst_26 : f32 to vector<16x1xf32>
    %88 = arith.addf %86, %87 : vector<16x1xf32>
    %89 = math.rsqrt %88 : vector<16x1xf32>
    %90 = vector.broadcast %89 : vector<16x1xf32> to vector<16x32xf32>
    %91 = arith.mulf %81, %90 : vector<16x32xf32>
    %92 = vector.broadcast %74 : vector<1x32xf32> to vector<16x32xf32>
    %93 = arith.mulf %91, %92 : vector<16x32xf32>
    %94 = vector.broadcast %75 : vector<1x32xf32> to vector<16x32xf32>
    %95 = arith.addf %93, %94 : vector<16x32xf32>
    %96 = arith.addf %95, %0 : vector<16x32xf32>
    %c0_27 = arith.constant 0 : index
    %c0_28 = arith.constant 0 : index
    %97 = vector.load %arg3[%c0_27, %c0_28] : memref<16x32xf32, #tpu.memory_space<vmem>>, vector<16x32xf32>
    tpu.vector_store %arg3[%c0_27, %c0_28], %96 {strides = array<i32>} : memref<16x32xf32, #tpu.memory_space<vmem>>, vector<16x32xf32>,
    return
  }
  func.func @transform_0(%arg0: i32) -> (i32, i32) {
    %c0_i32 = arith.constant 0 : i32
    %c0_i32_0 = arith.constant 0 : i32
    %c0_i32_1 = arith.constant 0 : i32
    return %c0_i32, %c0_i32_0 : i32, i32
  }
  func.func @transform_1(%arg0: i32) -> (i32, i32) {
    %c0_i32 = arith.constant 0 : i32
    %c0_i32_0 = arith.constant 0 : i32
    %c0_i32_1 = arith.constant 0 : i32
    return %c0_i32, %c0_i32_0 : i32, i32
  }
  func.func @transform_2(%arg0: i32) -> (i32, i32) {
    %c0_i32 = arith.constant 0 : i32
    %c0_i32_0 = arith.constant 0 : i32
    %c0_i32_1 = arith.constant 0 : i32
    return %c0_i32, %c0_i32_0 : i32, i32
  }
}

</mosaic_0001>

<bundles_post_ra>
// kernel: transformer_forward.1
= control target key start
LH: loop header
LB: loop body
LE: loop exit
PB: predicated region body
PF: predicated region fallthrough
CT: control target
= control target key end

     0   :  { %7 = vsyncpa [#allocation3], 0  ;;  %s1747_s0 = inlined_call_operand.hbm [shape: f32[16,32], index: 0, kind: input, shape index: {}]   ;;  %s1748_s1 = inlined_call_operand.hbm [shape: f32[56,128], index: 1, kind: input, shape index: {}]   ;;  %s1749_s2 = inlined_call_operand.hbm [shape: f32[16,32], index: 2, kind: output, shape index: {}]  }
   0x1   :  { %8 = vsyncpa [#allocation6], 0 }
   0x2   :  { %9 = vsyncpa [#allocation4], 0  ;;  %s1511_s9 = smov [#allocation2]   ;;  %s1439_s13 = scalar_lea.hbm %s1747_s0, 256 }
   0x3   :  { %s15_s10 = sshll.u32 %s1511_s9, 4  ;;  %p1440_p0 = scmp.ne.s32.totalorder %s1747_s0, %s1439_s13  ;;  %s16_s10 = int_to_ptr.vmem [resolvable:$true] %s15_s10 }
   0x4   :  { %p1443_p1 = scmp.lt.u32.totalorder %s1439_s13, %s1747_s0 }
   0x6   :  { %p1445_p2 = pnand %p1443_p1, %p1440_p0 }
   0x8   :  { %1448 = shalt.err (!%p1445_p2)
}
   0x9   :  { %s1449_s18 = scalar_lea.vmem %s16_s10, 256  ;;  %p1454_p4 = scmp.lt.s32.totalorder %s16_s10, %s16_s10 }
   0xa   :  { %p1450_p3 = scmp.ne.s32.totalorder %s16_s10, %s1449_s18  ;;  %p1455_p5 = scmp.lt.s32.totalorder %s1449_s18, %s1449_s18 }
   0xc   :  { %p1456_p6 = por %p1455_p5, %p1454_p4 }
   0xe   :  { %p1457_p7 = pnand %p1456_p6, %p1450_p3 }
  0x10   :  { %1460 = shalt.err (!%p1457_p7)
}
  0x11   :  { %s1512_s19 = smov 128   ;;  %s1513_s20 = smov 8  }
  0x12   :  { %21 = dma.hbm_to_vmem [thread:$0]  %s1747_s0, 256, %s16_s10, [#allocation3], %s1512_s19, %s1512_s19, %s1513_s20  }
  0x13   :  { %s1514_s23 = smov [#allocation5]   ;;  %s1461_s27 = scalar_lea.hbm %s1748_s1, 896 }
  0x14   :  { %s27_s24 = sshll.u32 %s1514_s23, 4  ;;  %p1462_p8 = scmp.ne.s32.totalorder %s1748_s1, %s1461_s27  ;;  %s28_s24 = int_to_ptr.vmem [resolvable:$true] %s27_s24 }
  0x15   :  { %p1465_p9 = scmp.lt.u32.totalorder %s1461_s27, %s1748_s1 }
  0x17   :  { %p1467_p10 = pnand %p1465_p9, %p1462_p8 }
  0x19   :  { %1470 = shalt.err (!%p1467_p10)
}
  0x1a   :  { %s1471_s4 = scalar_lea.vmem %s28_s24, 896  ;;  %p1476_p12 = scmp.lt.s32.totalorder %s28_s24, %s28_s24 }
  0x1b   :  { %p1472_p11 = scmp.ne.s32.totalorder %s28_s24, %s1471_s4  ;;  %p1477_p13 = scmp.lt.s32.totalorder %s1471_s4, %s1471_s4 }
  0x1d   :  { %p1478_p0 = por %p1477_p13, %p1476_p12 }
  0x1f   :  { %p1479_p1 = pnand %p1478_p0, %p1472_p11 }
  0x21   :  { %1482 = shalt.err (!%p1479_p1)
}
  0x22   :  { %33 = dma.hbm_to_vmem [thread:$0]  %s1748_s1, 896, %s28_s24, [#allocation6], %s1512_s19, %s1512_s19, %s1513_s20  }
  0x23   :  { %1505 = dma.done.wait [#allocation3], 256  }
  0x24   :  { %1506 = vsyncadd [#allocation3], 4294967040 }
  0x25   :  { %1507 = dma.done.wait [#allocation6], 896  }
  0x26   :  { %1508 = vsyncadd [#allocation6], 4294966400  ;;  %vm53_vm0 = vcmask 261120   ;;  %v1575_v0 = vld [vmem:[#allocation5] sm:$0xff]  ;;  %v1577_v1 = vld [vmem:[#allocation5 + $0x8] sm:$0xff]  ;;  %v49_v9 = vlaneseq  ;;  %vm141_vm1 = vcmask 64512  }
  0x27   :  { %v1579_v2 = vld [vmem:[#allocation5 + $0x10] sm:$0xff]  ;;  %v1393_v3 = vpack.i.bf16 %v1577_v1, %v1575_v0  ;;  %v1278_v4 = vpack.c.bf16 %v1577_v1, %v1575_v0  ;;  %v1585_v5 = vld [vmem:[#allocation5 + $0x18] sm:$0xff]  ;;  %v1600_v12 = vld [vmem:[#allocation5 + $0x20] sm:$0xff]  ;;  %s1515_s1 = smov 96   ;;  %vm225_vm3 = vcmask 130048   ;;  %s1516_s6 = smov 64  }
  0x28   :  { %v1587_v6 = vld [vmem:[#allocation2] sm:$0xff]  ;;  %v1282_v7 = vpack.c.bf16 %v1585_v5, %v1579_v2  ;;  %v1593_v8 = vld [vmem:[#allocation2 + $0x8] sm:$0xff]  ;;  %v1597_v10 = vshrl.u32 %v49_v9, 7  ;;  %vm1616_vm2 = vmpackc.low %vm141_vm1, %vm141_vm1  ;;  %s1517_s7 = smov 88   ;;  %s1518_s8 = smov 120   ;;  %vm963_vm4 = vcmask 195584  }
  0x29   :  { %1208 = vmatprep.mubr.msk.f32.mxu0 %vm53_vm0, %v1587_v6  ;;  %1279 = vmatprep.subr.bf16.mxu0 %v1278_v4  ;;  %v1626_v24 = vld [vmem:[#allocation5 + $0x30] sm:$0xff]  ;;  %v1628_v25 = vld [vmem:[#allocation5 + $0x28] sm:$0xff]  ;;  %s1519_s9 = smov 56   ;;  %s1520_s10 = smov 80  }
  0x2a   :  { %1281 = vmatpush3.bf16.msra.mxu0 %v1278_v4  ;;  %v51_v11 = vsub.s32 0, %v1597_v10  ;;  %s1521_s11 = smov 112   ;;  %s1522_s12 = smov 72  }
  0x2b   :  { %1283 = vmatprep.subr.bf16.mxu0 %v1282_v7  ;;  %s1523_s13 = smov 104   ;;  %s1524_s14 = smov 48  }
  0x2c   :  { %v52_v13 = vrot.slane %v1600_v12, %v51_v11  ;;  %s1525_s15 = smov 32   ;;  %s1526_s16 = smov 40  }
  0x2d   :  { %s1527_s17 = smov 16   ;;  %s1528_s18 = smov 24  }
  0x2e   :  { %1285 = vmatpush3.bf16.msra.mxu0 %v1282_v7  ;;  %s1529_s21 = smov [#allocation7]  }
  0x2f   :  { %s1115_s22 = sshll.u32 %s1529_s21, 4  ;;  %s1116_s22 = int_to_ptr.vmem [resolvable:$true] %s1115_s22 }
  0x30   :  { %s1483_s23 = scalar_lea.vmem %s1116_s22, 256  ;;  %p1488_p3 = scmp.lt.s32.totalorder %s1116_s22, %s1116_s22 }
  0x31   :  { %1209 = vmatmul.mubr.msk.f32.vlgmr.msra.gmra.mrb[0].mxu0 %vm53_vm0, %v1593_v8  ;;  %p1484_p2 = scmp.ne.s32.totalorder %s1116_s22, %s1483_s23  ;;  %p1489_p4 = scmp.lt.s32.totalorder %s1483_s23, %s1483_s23 }
  0x33   :  { %p1490_p5 = por %p1489_p4, %p1488_p3 }
  0x35   :  { %p1491_p6 = pnand %p1490_p5, %p1484_p2 }
 0x104   :  { %v1210_v14 = vpop.f32.mrb[0].mxu0 }
 0x105   :  { %v1603_v15 = vadd.f32 %v1210_v14, %v52_v13  ;;  %v126_v16 = vpop.f32.mrb[1].mxu0 }
 0x106   :  { %v1605_v17 = vadd.f32 %v126_v16, %v52_v13 }
 0x108   :  { %1215 = vmatprep.mubr.msk.f32.mxu1 %vm141_vm1, %v1605_v17  ;;  %v1611_v18 = vpack.i.bf16 %v1603_v15, %v1605_v17 }
 0x10a   :  { %1354 = vrot.lane.b32.xlu0 %v1611_v18, %s1515_s1 }
 0x17c   :  { %v1355_v19 = vpop.permute.xlu0 %1354 }
 0x17d   :  { %v1357_v20 = vunpack.i.h.bf16 %v1355_v19  ;;  %v1356_v21 = vunpack.i.l.bf16 %v1355_v19 }
 0x17f   :  { %v1286_v23 = vpack.c.bf16 %v1357_v20, %v1356_v21 }
 0x181   :  { %1288 = vmatprep.subr.msk.bf16.mxu1 %vm1616_vm2, %v1286_v23 }
 0x182   :  { %1291 = vmatpush3.bf16.xpose.msk.msra.mxu1 %vm1616_vm2, %v1286_v23 }
 0x189   :  { %1216 = vmatmul.mubr.msk.f32.vlgmr.msra.gmra.mrb[0].mxu1 %vm141_vm1, %v1603_v15 }
 0x25c   :  { %v1217_v26 = vpop.f32.mrb[0].mxu1 }
 0x25d   :  { %v222_v27 = vadd.f32 %v1217_v26, %v1626_v24  ;;  %v216_v28 = vpop.f32.mrb[1].mxu1 }
 0x25e   :  { %v217_v29 = vadd.f32 %v216_v28, %v1628_v25 }
 0x25f   :  { %v229_v30 = vsel %vm225_vm3, %v222_v27, -inf }
 0x260   :  { %230 = vmax.xlane.f32.xlu1 %v229_v30  ;;  %v226_v31 = vsel %vm225_vm3, %v217_v29, -inf }
 0x261   :  { %227 = vmax.xlane.f32.xlu0 %v226_v31 }
 0x271   :  { %1359 = vrot.lane.b32.xlu1 %v1611_v18, %s1516_s6 }
 0x275   :  { %1364 = vrot.lane.b32.xlu1 %v1611_v18, %s1517_s7 }
 0x277   :  { %337 = vrot.lane.b32.xlu0 %v1603_v15, %s1518_s8 }
 0x2ed   :  { %v231_v32 = vpop.xlane.xlu1 %230 }
 0x2ee   :  { %v233_v33 = vsub.f32 %v222_v27, %v231_v32  ;;  %v228_v34 = vpop.xlane.xlu0 %227 }
 0x2ef   :  { %v232_v35 = vsub.f32 %v217_v29, %v228_v34 }
 0x2f0   :  { %v236_v36 = vmul.f32 1.442695, %v233_v33 }
 0x2f1   :  { %v234_v37 = vmul.f32 1.442695, %v232_v35  ;;  %v1360_v38 = vpop.permute.xlu1 %1359 }
 0x2f2   :  { %1403 = vpow2.f32 %v236_v36  ;;  %v1362_v39 = vunpack.i.h.bf16 %v1360_v38  ;;  %v1361_v40 = vunpack.i.l.bf16 %v1360_v38  ;;  %v338_v57 = vpop.permute.xlu0 %337 }
 0x2f3   :  { %1405 = vpow2.f32 %v234_v37 }
 0x2f4   :  { %v1292_v41 = vpack.c.bf16 %v1362_v39, %v1361_v40 }
 0x2f5   :  { %v1365_v42 = vpop.permute.xlu1 %1364 }
 0x2f6   :  { %v1367_v43 = vunpack.i.h.bf16 %v1365_v42  ;;  %v1366_v44 = vunpack.i.l.bf16 %v1365_v42  ;;  %1293 = vmatprep.subr.bf16.mxu1 %v1292_v41 }
 0x2f7   :  { %1295 = vmatpush3.bf16.msra.mxu1 %v1292_v41 }
 0x2f8   :  { %v1296_v45 = vpack.c.bf16 %v1367_v43, %v1366_v44 }
 0x2fa   :  { %1298 = vmatprep.subr.msk.bf16.mxu1 %vm1616_vm2, %v1296_v45 }
 0x2fc   :  { %v1404_v46 = vpop.eup %1403 }
 0x2fd   :  { %v241_v47 = vsel %vm225_vm3, %v1404_v46, 0.0  ;;  %v1406_v48 = vpop.eup %1405 }
 0x2fe   :  { %242 = vadd.xlane.f32.xlu1 %v241_v47  ;;  %v238_v49 = vsel %vm225_vm3, %v1406_v48, 0.0 }
 0x302   :  { %239 = vadd.xlane.f32.xlu1 %v238_v49 }
 0x313   :  { %335 = vrot.lane.b32.xlu1 %v1605_v17, %s1518_s8 }
 0x38b   :  { %v243_v50 = vpop.xlane.xlu1 %242 }
 0x38c   :  { %1407 = vrcp.f32 %v243_v50 }
 0x38f   :  { %v240_v51 = vpop.xlane.xlu1 %239 }
 0x390   :  { %1409 = vrcp.f32 %v240_v51 }
 0x393   :  { %v336_v56 = vpop.permute.xlu1 %335 }
 0x396   :  { %v1408_v52 = vpop.eup %1407 }
 0x397   :  { %v247_v55 = vmul.f32 %v1408_v52, %v1404_v46 }
 0x39a   :  { %v1410_v53 = vpop.eup %1409 }
 0x39b   :  { %v245_v54 = vmul.f32 %v1410_v53, %v1406_v48 }
 0x39d   :  { %1222 = vmatprep.mubr.msk.f32.mxu1 %vm225_vm3, %v245_v54 }
 0x39e   :  { %1223 = vmatmul.mubr.msk.f32.vlgmr.msra.gmra.mrb[2].mxu1 %vm225_vm3, %v247_v55 }
 0x39f   :  { %1301 = vmatpush3.bf16.xpose.msk.msra.mxu1 %vm1616_vm2, %v1296_v45  ;;  %1229 = vmatprep.mubr.msk.f32.mxu1 %vm141_vm1, %v336_v56 }
 0x3a6   :  { %1230 = vmatmul.mubr.msk.f32.vlgmr.msra.gmra.mrb[4].mxu1 %vm141_vm1, %v338_v57 }
 0x471   :  { %v1648_v58 = vpop.f32.mrb[2].mxu1 }
 0x472   :  { %v1650_v59 = vpop.f32.mrb[3].mxu1 }
 0x479   :  { %v1231_v60 = vpop.f32.mrb[4].mxu1 }
 0x47a   :  { %v423_v61 = vadd.f32 %v1231_v60, %v1626_v24  ;;  %v417_v62 = vpop.f32.mrb[5].mxu1 }
 0x47b   :  { %v418_v63 = vadd.f32 %v417_v62, %v1628_v25 }
 0x47c   :  { %v429_v4 = vsel %vm225_vm3, %v423_v61, -inf }
 0x47d   :  { %430 = vmax.xlane.f32.xlu0 %v429_v4  ;;  %v426_v7 = vsel %vm225_vm3, %v418_v63, -inf }
 0x47e   :  { %427 = vmax.xlane.f32.xlu1 %v426_v7 }
 0x48f   :  { %1369 = vrot.lane.b32.xlu1 %v1611_v18, %s1519_s9 }
 0x493   :  { %1374 = vrot.lane.b32.xlu0 %v1611_v18, %s1520_s10  ;;  %535 = vrot.lane.b32.xlu1 %v1605_v17, %s1521_s11 }
 0x50a   :  { %v431_v9 = vpop.xlane.xlu0 %430 }
 0x50b   :  { %v433_v11 = vsub.f32 %v423_v61, %v431_v9  ;;  %v428_v13 = vpop.xlane.xlu1 %427 }
 0x50c   :  { %v432_v14 = vsub.f32 %v418_v63, %v428_v13 }
 0x50d   :  { %v436_v16 = vmul.f32 1.442695, %v433_v11 }
 0x50e   :  { %v434_v19 = vmul.f32 1.442695, %v432_v14  ;;  %v1375_v20 = vpop.permute.xlu0 %1374 }
 0x50f   :  { %1411 = vpow2.f32 %v436_v16  ;;  %v1370_v21 = vpop.permute.xlu1 %1369  ;;  %v1377_v23 = vunpack.i.h.bf16 %v1375_v20  ;;  %v1376_v26 = vunpack.i.l.bf16 %v1375_v20 }
 0x510   :  { %v1372_v27 = vunpack.i.h.bf16 %v1370_v21  ;;  %v1371_v28 = vunpack.i.l.bf16 %v1370_v21  ;;  %1413 = vpow2.f32 %v434_v19 }
 0x511   :  { %v1306_v30 = vpack.c.bf16 %v1377_v23, %v1376_v26 }
 0x512   :  { %v1302_v29 = vpack.c.bf16 %v1372_v27, %v1371_v28 }
 0x513   :  { %v536_v35 = vpop.permute.xlu1 %535 }
 0x514   :  { %1303 = vmatprep.subr.bf16.mxu0 %v1302_v29 }
 0x515   :  { %1305 = vmatpush3.bf16.msra.mxu0 %v1302_v29 }
 0x516   :  { %1308 = vmatprep.subr.msk.bf16.mxu0 %vm1616_vm2, %v1306_v30 }
 0x519   :  { %v1412_v31 = vpop.eup %1411 }
 0x51a   :  { %v441_v32 = vsel %vm225_vm3, %v1412_v31, 0.0  ;;  %v1414_v33 = vpop.eup %1413 }
 0x51b   :  { %442 = vadd.xlane.f32.xlu1 %v441_v32  ;;  %v438_v34 = vsel %vm225_vm3, %v1414_v33, 0.0 }
 0x51f   :  { %439 = vadd.xlane.f32.xlu1 %v438_v34 }
 0x530   :  { %537 = vrot.lane.b32.xlu1 %v1603_v15, %s1521_s11 }
 0x5a8   :  { %v443_v36 = vpop.xlane.xlu1 %442 }
 0x5a9   :  { %1415 = vrcp.f32 %v443_v36 }
 0x5ac   :  { %v440_v37 = vpop.xlane.xlu1 %439 }
 0x5ad   :  { %1417 = vrcp.f32 %v440_v37 }
 0x5b0   :  { %v538_v42 = vpop.permute.xlu1 %537 }
 0x5b3   :  { %v1416_v38 = vpop.eup %1415 }
 0x5b4   :  { %v447_v41 = vmul.f32 %v1416_v38, %v1412_v31 }
 0x5b7   :  { %v1418_v39 = vpop.eup %1417 }
 0x5b8   :  { %v445_v40 = vmul.f32 %v1418_v39, %v1414_v33 }
 0x5ba   :  { %1236 = vmatprep.mubr.msk.f32.mxu0 %vm225_vm3, %v445_v40 }
 0x5bb   :  { %1237 = vmatmul.mubr.msk.f32.vlgmr.msra.gmra.mrb[2].mxu0 %vm225_vm3, %v447_v41 }
 0x5bc   :  { %1311 = vmatpush3.bf16.xpose.msk.msra.mxu0 %vm1616_vm2, %v1306_v30  ;;  %1243 = vmatprep.mubr.msk.f32.mxu0 %vm141_vm1, %v536_v35 }
 0x5c3   :  { %1244 = vmatmul.mubr.msk.f32.vlgmr.msra.gmra.mrb[4].mxu0 %vm141_vm1, %v538_v42 }
 0x68e   :  { %v1670_v43 = vpop.f32.mrb[2].mxu0 }
 0x68f   :  { %v1672_v44 = vpop.f32.mrb[3].mxu0 }
 0x696   :  { %v1245_v45 = vpop.f32.mrb[4].mxu0 }
 0x697   :  { %v623_v46 = vadd.f32 %v1245_v45, %v1626_v24  ;;  %v617_v47 = vpop.f32.mrb[5].mxu0  ;;  %v1398_v45 = vpack.i.bf16 %v1585_v5, %v1579_v2 }
 0x698   :  { %v618_v48 = vadd.f32 %v617_v47, %v1628_v25 }
 0x699   :  { %v629_v49 = vsel %vm225_vm3, %v623_v46, -inf }
 0x69a   :  { %630 = vmax.xlane.f32.xlu0 %v629_v49  ;;  %v626_v50 = vsel %vm225_vm3, %v618_v48, -inf }
 0x69b   :  { %627 = vmax.xlane.f32.xlu1 %v626_v50 }
 0x727   :  { %v631_v51 = vpop.xlane.xlu0 %630 }
 0x728   :  { %v633_v52 = vsub.f32 %v623_v46, %v631_v51  ;;  %v628_v53 = vpop.xlane.xlu1 %627 }
 0x729   :  { %v632_v54 = vsub.f32 %v618_v48, %v628_v53 }
 0x72a   :  { %v636_v55 = vmul.f32 1.442695, %v633_v52 }
 0x72b   :  { %v634_v56 = vmul.f32 1.442695, %v632_v54 }
 0x72c   :  { %1419 = vpow2.f32 %v636_v55 }
 0x72d   :  { %1421 = vpow2.f32 %v634_v56 }
 0x736   :  { %v1420_v57 = vpop.eup %1419 }
 0x737   :  { %v1422_v60 = vpop.eup %1421  ;;  %v641_v61 = vsel %vm225_vm3, %v1420_v57, 0.0 }
 0x738   :  { %642 = vadd.xlane.f32.xlu1 %v641_v61  ;;  %v638_v62 = vsel %vm225_vm3, %v1422_v60, 0.0 }
 0x739   :  { %639 = vadd.xlane.f32.xlu0 %v638_v62 }
 0x749   :  { %1384 = vrot.lane.b32.xlu1 %v1611_v18, %s1522_s12 }
 0x74d   :  { %735 = vrot.lane.b32.xlu1 %v1605_v17, %s1523_s13 }
 0x74f   :  { %1379 = vrot.lane.b32.xlu0 %v1611_v18, %s1524_s14 }
 0x753   :  { %737 = vrot.lane.b32.xlu0 %v1603_v15, %s1523_s13 }
 0x7c5   :  { %v643_v63 = vpop.xlane.xlu1 %642 }
 0x7c6   :  { %1423 = vrcp.f32 %v643_v63  ;;  %v640_v4 = vpop.xlane.xlu0 %639 }
 0x7c7   :  { %1425 = vrcp.f32 %v640_v4 }
 0x7c9   :  { %v1385_v7 = vpop.permute.xlu1 %1384 }
 0x7ca   :  { %v1380_v9 = vpop.permute.xlu0 %1379  ;;  %v1387_v11 = vunpack.i.h.bf16 %v1385_v7  ;;  %v1386_v13 = vunpack.i.l.bf16 %v1385_v7 }
 0x7cb   :  { %v1382_v14 = vunpack.i.h.bf16 %v1380_v9  ;;  %v1381_v16 = vunpack.i.l.bf16 %v1380_v9 }
 0x7cc   :  { %v1316_v20 = vpack.c.bf16 %v1387_v11, %v1386_v13 }
 0x7cd   :  { %v1312_v19 = vpack.c.bf16 %v1382_v14, %v1381_v16  ;;  %v736_v26 = vpop.permute.xlu1 %735 }
 0x7ce   :  { %v738_v27 = vpop.permute.xlu0 %737 }
 0x7cf   :  { %1313 = vmatprep.subr.bf16.mxu1 %v1312_v19 }
 0x7d0   :  { %v1424_v21 = vpop.eup %1423  ;;  %1315 = vmatpush3.bf16.msra.mxu1 %v1312_v19 }
 0x7d1   :  { %v1426_v17 = vpop.eup %1425  ;;  %1318 = vmatprep.subr.msk.bf16.mxu1 %vm1616_vm2, %v1316_v20  ;;  %v647_v23 = vmul.f32 %v1424_v21, %v1420_v57 }
 0x7d2   :  { %v645_v15 = vmul.f32 %v1426_v17, %v1422_v60 }
 0x7d4   :  { %1250 = vmatprep.mubr.msk.f32.mxu1 %vm225_vm3, %v645_v15 }
 0x7d5   :  { %1251 = vmatmul.mubr.msk.f32.vlgmr.msra.gmra.mrb[6].mxu1 %vm225_vm3, %v647_v23 }
 0x7d6   :  { %1257 = vmatprep.mubr.msk.f32.mxu1 %vm141_vm1, %v736_v26 }
 0x7d9   :  { %1321 = vmatpush3.bf16.xpose.msk.msra.mxu1 %vm1616_vm2, %v1316_v20  ;;  %v968_v20 = vsub.s32 1, %v1597_v10 }
 0x7db   :  { %v969_v21 = vrot.slane %v1600_v12, %v968_v20 }
 0x7e0   :  { %1258 = vmatmul.mubr.msk.f32.vlgmr.msra.gmra.mrb[8].mxu1 %vm141_vm1, %v738_v27 }
 0x8a8   :  { %v1252_v28 = vpop.f32.mrb[6].mxu1 }
 0x8a9   :  { %v726_v29 = vpop.f32.mrb[7].mxu1 }
 0x8b3   :  { %v1259_v30 = vpop.f32.mrb[8].mxu1 }
 0x8b4   :  { %v823_v31 = vadd.f32 %v1259_v30, %v1626_v24  ;;  %v817_v32 = vpop.f32.mrb[9].mxu1 }
 0x8b5   :  { %v818_v33 = vadd.f32 %v817_v32, %v1628_v25 }
 0x8b6   :  { %v829_v34 = vsel %vm225_vm3, %v823_v31, -inf }
 0x8b7   :  { %830 = vmax.xlane.f32.xlu0 %v829_v34  ;;  %v826_v35 = vsel %vm225_vm3, %v818_v33, -inf }
 0x8b8   :  { %827 = vmax.xlane.f32.xlu1 %v826_v35 }
 0x944   :  { %v831_v36 = vpop.xlane.xlu0 %830 }
 0x945   :  { %v833_v22 = vsub.f32 %v823_v31, %v831_v36  ;;  %v828_v37 = vpop.xlane.xlu1 %827 }
 0x946   :  { %v832_v38 = vsub.f32 %v818_v33, %v828_v37 }
 0x947   :  { %v836_v39 = vmul.f32 1.442695, %v833_v22 }
 0x948   :  { %v834_v40 = vmul.f32 1.442695, %v832_v38 }
 0x949   :  { %1427 = vpow2.f32 %v836_v39 }
 0x94a   :  { %1429 = vpow2.f32 %v834_v40 }
 0x953   :  { %v1428_v41 = vpop.eup %1427 }
 0x954   :  { %v1430_v42 = vpop.eup %1429  ;;  %v841_v24 = vsel %vm225_vm3, %v1428_v41, 0.0 }
 0x955   :  { %842 = vadd.xlane.f32.xlu1 %v841_v24  ;;  %v838_v25 = vsel %vm225_vm3, %v1430_v42, 0.0  ;;  %v1102_v24 = vsub.s32 3, %v1597_v10 }
 0x956   :  { %839 = vadd.xlane.f32.xlu0 %v838_v25 }
 0x966   :  { %1394 = vrot.lane.b32.xlu1 %v1393_v3, %s1525_s15 }
 0x96a   :  { %1399 = vrot.lane.b32.xlu1 %v1398_v45, %s1525_s15 }
 0x96c   :  { %1389 = vrot.lane.b32.xlu0 %v1611_v18, %s1526_s16 }
 0x96e   :  { %939 = vrot.lane.b32.xlu1 %v1670_v43, %s1513_s20 }
 0x970   :  { %937 = vrot.lane.b32.xlu0 %v1672_v44, %s1513_s20 }
 0x972   :  { %947 = vrot.lane.b32.xlu1 %v1252_v28, %s1527_s17 }
 0x974   :  { %945 = vrot.lane.b32.xlu0 %v726_v29, %s1527_s17 }
 0x9e2   :  { %v843_v46 = vpop.xlane.xlu1 %842 }
 0x9e3   :  { %1431 = vrcp.f32 %v843_v46  ;;  %v840_v0 = vpop.xlane.xlu0 %839  ;;  %v1103_v46 = vrot.slane %v1600_v12, %v1102_v24 }
 0x9e4   :  { %1433 = vrcp.f32 %v840_v0 }
 0x9e6   :  { %v1395_v1 = vpop.permute.xlu1 %1394 }
 0x9e7   :  { %v1397_v3 = vunpack.i.h.bf16 %v1395_v1  ;;  %v1396_v2 = vunpack.i.l.bf16 %v1395_v1  ;;  %v1390_v5 = vpop.permute.xlu0 %1389 }
 0x9e8   :  { %v1392_v47 = vunpack.i.h.bf16 %v1390_v5  ;;  %v1391_v48 = vunpack.i.l.bf16 %v1390_v5 }
 0x9e9   :  { %v1326_v18 = vpack.c.bf16 %v1397_v3, %v1396_v2 }
 0x9ea   :  { %v1322_v49 = vpack.c.bf16 %v1392_v47, %v1391_v48  ;;  %v1400_v50 = vpop.permute.xlu1 %1399 }
 0x9eb   :  { %v1402_v43 = vunpack.i.h.bf16 %v1400_v50  ;;  %v1401_v51 = vunpack.i.l.bf16 %v1400_v50  ;;  %v938_v61 = vpop.permute.xlu0 %937 }
 0x9ec   :  { %1323 = vmatprep.subr.bf16.mxu0 %v1322_v49  ;;  %v959_v4 = vsel %vm141_vm1, %v1650_v59, %v938_v61 }
 0x9ed   :  { %v1432_v44 = vpop.eup %1431  ;;  %1325 = vmatpush3.bf16.msra.mxu0 %v1322_v49  ;;  %v1330_v55 = vpack.c.bf16 %v1402_v43, %v1401_v51 }
 0x9ee   :  { %v1434_v52 = vpop.eup %1433  ;;  %1327 = vmatprep.subr.bf16.mxu0 %v1326_v18  ;;  %v847_v54 = vmul.f32 %v1432_v44, %v1428_v41  ;;  %v940_v60 = vpop.permute.xlu1 %939 }
 0x9ef   :  { %v845_v53 = vmul.f32 %v1434_v52, %v1430_v42  ;;  %v946_v63 = vpop.permute.xlu0 %945  ;;  %v960_v9 = vsel %vm141_vm1, %v1648_v58, %v940_v60  ;;  %v1096_v42 = vsub.s32 2, %v1597_v10 }
 0x9f0   :  { %v961_v11 = vsel %vm225_vm3, %v959_v4, %v946_v63 }
 0x9f1   :  { %1264 = vmatprep.mubr.msk.f32.mxu0 %vm225_vm3, %v845_v53  ;;  %v1097_v25 = vrot.slane %v1600_v12, %v1096_v42 }
 0x9f2   :  { %1265 = vmatmul.mubr.msk.f32.vlgmr.msra.gmra.mrb[6].mxu0 %vm225_vm3, %v847_v54  ;;  %v948_v62 = vpop.permute.xlu1 %947 }
 0x9f3   :  { %1329 = vmatpush3.bf16.msra.mxu0 %v1326_v18  ;;  %v962_v14 = vsel %vm225_vm3, %v960_v9, %v948_v62 }
 0x9f4   :  { %1331 = vmatprep.subr.bf16.mxu0 %v1330_v55 }
 0x9f7   :  { %1333 = vmatpush3.bf16.msra.mxu0 %v1330_v55 }
 0xac5   :  { %v1266_v56 = vpop.f32.mrb[6].mxu0 }
 0xac6   :  { %955 = vrot.lane.b32.xlu1 %v1266_v56, %s1528_s18  ;;  %v926_v57 = vpop.f32.mrb[7].mxu0 }
 0xac7   :  { %953 = vrot.lane.b32.xlu0 %v926_v57, %s1528_s18 }
 0xb38   :  { %v956_v7 = vpop.permute.xlu1 %955 }
 0xb39   :  { %v954_v13 = vpop.permute.xlu0 %953  ;;  %v965_v19 = vsel %vm963_vm4, %v962_v14, %v956_v7 }
 0xb3a   :  { %v964_v16 = vsel %vm963_vm4, %v961_v11, %v954_v13 }
 0xb3b   :  { %1275 = vmatprep.mubr.msk.f32.mxu0 %vm53_vm0, %v964_v16 }
 0xb3c   :  { %1276 = vmatmul.mubr.msk.f32.vlgmr.msra.gmra.mrb[8].mxu0 %vm53_vm0, %v965_v19 }
 0xc0f   :  { %v1277_v59 = vpop.f32.mrb[8].mxu0 }
 0xc10   :  { %v1064_v17 = vadd.f32 %v1277_v59, %v969_v21  ;;  %v1058_v15 = vpop.f32.mrb[9].mxu0 }
 0xc11   :  { %v1059_v23 = vadd.f32 %v1058_v15, %v969_v21 }
 0xc12   :  { %v1070_v58 = vsel %vm53_vm0, %v1064_v17, 0.0 }
 0xc13   :  { %1071 = vadd.xlane.f32.xlu1 %v1070_v58  ;;  %v1067_v26 = vsel %vm53_vm0, %v1059_v23, 0.0 }
 0xc14   :  { %1068 = vadd.xlane.f32.xlu0 %v1067_v26 }
 0xca0   :  { %v1072_v27 = vpop.xlane.xlu1 %1071 }
 0xca1   :  { %v1075_v28 = vmul.f32 0.03125, %v1072_v27  ;;  %v1069_v29 = vpop.xlane.xlu0 %1068 }
 0xca2   :  { %v1074_v30 = vmul.f32 0.03125, %v1069_v29 }
 0xca3   :  { %v1077_v31 = vsub.f32 %v1064_v17, %v1075_v28 }
 0xca4   :  { %v1076_v32 = vsub.f32 %v1059_v23, %v1074_v30 }
 0xca5   :  { %v1079_v35 = vmul.f32 %v1077_v31, %v1077_v31 }
 0xca6   :  { %v1078_v33 = vmul.f32 %v1076_v32, %v1076_v32 }
 0xca7   :  { %v1083_v36 = vsel %vm53_vm0, %v1079_v35, 0.0 }
 0xca8   :  { %v1080_v34 = vsel %vm53_vm0, %v1078_v33, 0.0 }
 0xca9   :  { %1081 = vadd.xlane.f32.xlu0 %v1080_v34 }
 0xcad   :  { %1084 = vadd.xlane.f32.xlu0 %v1083_v36 }
 0xd36   :  { %v1082_v22 = vpop.xlane.xlu0 %1081 }
 0xd37   :  { %v1086_v37 = vmul.f32 0.03125, %v1082_v22 }
 0xd39   :  { %v1088_v38 = vadd.f32 1e-05, %v1086_v37 }
 0xd3a   :  { %v1085_v39 = vpop.xlane.xlu0 %1084 }
 0xd3b   :  { %1435 = vrsqrt.f32 %v1088_v38  ;;  %v1087_v40 = vmul.f32 0.03125, %v1085_v39 }
 0xd3d   :  { %v1089_v41 = vadd.f32 1e-05, %v1087_v40 }
 0xd3f   :  { %1437 = vrsqrt.f32 %v1089_v41 }
 0xd45   :  { %v1436_v45 = vpop.eup %1435 }
 0xd46   :  { %v1092_v0 = vmul.f32 %v1436_v45, %v1076_v32 }
 0xd48   :  { %v1098_v1 = vmul.f32 %v1097_v25, %v1092_v0 }
 0xd49   :  { %v1438_v3 = vpop.eup %1437 }
 0xd4a   :  { %v1093_v2 = vmul.f32 %v1438_v3, %v1077_v31  ;;  %v1104_v5 = vadd.f32 %v1103_v46, %v1098_v1 }
 0xd4c   :  { %v1099_v47 = vmul.f32 %v1097_v25, %v1093_v2  ;;  %v1106_v48 = vadd.f32 %v1104_v5, %v1587_v6 }
 0xd4e   :  { %v1105_v18 = vadd.f32 %v1103_v46, %v1099_v47  ;;  %1108 = vst.msk [vmem:[#allocation7] sm:$0xff] %vm53_vm0, %v1106_v48 }
 0xd50   :  { %v1107_v10 = vadd.f32 %v1105_v18, %v1593_v8 }
 0xd52   :  { %1109 = vst.msk [vmem:[#allocation7 + $0x8] sm:$0xff] %vm53_vm0, %v1107_v10 }
 0xd53   :  { %1494 = shalt.err (!%p1491_p6)
}
 0xd54   :  { %s1495_s26 = scalar_lea.hbm %s1749_s2, 256 }
 0xd55   :  { %p1496_p7 = scmp.ne.s32.totalorder %s1749_s2, %s1495_s26  ;;  %p1499_p8 = scmp.lt.u32.totalorder %s1495_s26, %s1749_s2 }
 0xd57   :  { %p1501_p9 = pnand %p1499_p8, %p1496_p7 }
 0xd59   :  { %1504 = shalt.err (!%p1501_p9)
}
 0xd5a   :  { %1121 = dma.vmem_to_hbm [thread:$0]  %s1116_s22, 256, %s1749_s2, [#allocation4], %s1512_s19, %s1512_s19, %s1513_s20  }
 0xd5b   :  { %1509 = dma.done.wait [#allocation4], 256  }
 0xd5c   :  { %1510 = vsyncadd [#allocation4], 4294967040 }
 0xd5d   :  { %1125 = vsyncpa [#allocation3], 1 }
 0xd5e   :  { %1126 = vsyncpa [#allocation6], 1 }
 0xd5f   :  { %1127 = vsyncpa [#allocation4], 1 }

</bundles_post_ra>
